<compile_context>
chip_gen: v6e
topology: v6e:2x2x1
jax: 0.10.0
libtpu: 0.0.40
codegen_flags: <defaults>
</compile_context>

<pallas_src>
import jax
import jax.numpy as jnp
from jax.experimental import pallas as pl
from jax.experimental.pallas import tpu as pltpu

# ----- model hyperparameters (from the PyTorch script) -----
HIDDEN_SIZE = 2
INPUT_SIZE = 1
NUM_CLASSES = 1
NUM_LAYERS = 3
SEQ_LENGTH = 4
BATCH = 2

NG = 4                       # gates per cell: [i, f, g, o] (PyTorch order)
GB = NG * BATCH              # stacked-gate rows (sublane axis)
LANES = 128                  # lane width of the packed parameter / output arrays
OUT_ROWS = 8                 # padded output rows (>= NUM_LAYERS*BATCH, multiple of 8)


# --------------------------------------------------------------------------
# packed-parameter layout (row offsets into the single (R, 128) param array)
# --------------------------------------------------------------------------
def _param_layout():
    layers = []
    r = 0
    for l in range(NUM_LAYERS):
        in_dim = INPUT_SIZE if l == 0 else HIDDEN_SIZE
        wx = r; r += in_dim * GB          # in_dim blocks of (GB, H): x-path weights
        wh = r; r += HIDDEN_SIZE * GB     # H blocks of (GB, H): h-path weights
        b = r;  r += GB                   # one (GB, H) block: folded bias
        layers.append({"wx": wx, "wh": wh, "b": b, "in_dim": in_dim})
    fc = r
    r += HIDDEN_SIZE + 1                  # H lane-broadcast weight rows + 1 bias row
    total = ((r + 7) // 8) * 8
    return layers, fc, total


# --------------------------------------------------------------------------
# Pallas kernel
# --------------------------------------------------------------------------
def lstm_kernel(x_ref, p_ref, out_ref):
    # x_ref: (SEQ_LENGTH * GB, INPUT_SIZE)  -- row t*GB + k*B + b = x[b, t, :]
    # p_ref: (R, 128) packed parameters
    # out_ref: (OUT_ROWS, 128) lane-dense padded output
    H = HIDDEN_SIZE
    B = BATCH
    T = SEQ_LENGTH
    layers, fc_off, _ = _param_layout()

    # Per-timestep layer-0 inputs, already tiled to the stacked-gate layout.
    seq = [x_ref[t * GB:(t + 1) * GB, :] for t in range(T)]      # (GB, 1) each

    h_finals = []
    for l in range(NUM_LAYERS):
        lo = layers[l]
        in_dim = lo["in_dim"]

        # Hoisted weight reads: once per layer, outside the serial t-loop.
        wx0 = lo["wx"]; wh0 = lo["wh"]; b0 = lo["b"]
        Wx = [p_ref[wx0 + j * GB: wx0 + (j + 1) * GB, 0:H] for j in range(in_dim)]
        Wh = [p_ref[wh0 + j * GB: wh0 + (j + 1) * GB, 0:H] for j in range(H)]
        bias = p_ref[b0: b0 + GB, 0:H]                            # (GB, H)

        c = jnp.zeros((B, H), jnp.float32)                        # c_0 = 0
        h = jnp.zeros((B, H), jnp.float32)                        # h_0 = 0
        hs = None                                                 # stacked h (GB, H)
        new_seq = []
        for t in range(T):                                        # fully unrolled
            xs = seq[t]                                           # (GB, in_dim)
            # VPU broadcast-FMA gate pre-activations (no MXU):
            acc = bias
            for j in range(in_dim):
                acc = acc + xs[:, j:j + 1] * Wx[j]
            if t > 0:                                             # h_0 == 0
                for j in range(H):
                    acc = acc + hs[:, j:j + 1] * Wh[j]
            # One sigmoid pass + one tanh pass over the whole (GB, H) gate stack.
            sig = jax.nn.sigmoid(acc)
            th = jnp.tanh(acc)
            # Gate selection = sublane row-block slices (not lane slices).
            i_g = sig[0 * B:1 * B, :]
            f_g = sig[1 * B:2 * B, :]
            g_g = th[2 * B:3 * B, :]
            o_g = sig[3 * B:4 * B, :]
            c = f_g * c + i_g * g_g
            h = o_g * jnp.tanh(c)
            hs = jnp.concatenate([h] * NG, axis=0)                # (GB, H) stacked copy
            new_seq.append(hs)
        seq = new_seq                                             # feeds next layer
        h_finals.append(h)                                        # final h of this layer

    # h_out = h_out.view(-1, H): layer-major (NUM_LAYERS*B, H), padded to 8 rows.
    h_pad = jnp.concatenate(
        h_finals + [jnp.zeros((OUT_ROWS - NUM_LAYERS * B, H), jnp.float32)],
        axis=0)                                                   # (8, H)

    # fc: Linear(H -> NUM_CLASSES) as VPU FMA against lane-broadcast weight rows.
    out = jnp.broadcast_to(p_ref[fc_off + H: fc_off + H + 1, :], (OUT_ROWS, LANES))
    for j in range(H):
        out = out + h_pad[:, j:j + 1] * p_ref[fc_off + j: fc_off + j + 1, :]
    out_ref[...] = out                                            # full (8,128) unmasked store


# --------------------------------------------------------------------------
# host-side packing
# --------------------------------------------------------------------------
def _pad_lanes(a):
    return jnp.pad(a, ((0, 0), (0, LANES - a.shape[1])))


def pack_params(params):
    """Pack all LSTM + FC parameters into one (R, 128) f32 array."""
    rows = []
    for l in range(NUM_LAYERS):
        w_ih, w_hh, b_ih, b_hh = params["lstm"][l]
        in_dim = w_ih.shape[1]
        # x-path: one (GB, H) block per input column j; row k*B+b = w_ih[k*H:(k+1)*H, j]
        for j in range(in_dim):
            wj = w_ih[:, j].reshape(NG, HIDDEN_SIZE)
            rows.append(_pad_lanes(jnp.repeat(wj, BATCH, axis=0)))
        # h-path: one (GB, H) block per hidden column j
        for j in range(HIDDEN_SIZE):
            uj = w_hh[:, j].reshape(NG, HIDDEN_SIZE)
            rows.append(_pad_lanes(jnp.repeat(uj, BATCH, axis=0)))
        # folded bias block
        bg = (b_ih + b_hh).reshape(NG, HIDDEN_SIZE)
        rows.append(_pad_lanes(jnp.repeat(bg, BATCH, axis=0)))
    # fc: lane-broadcast weight rows + bias row (for the lane-dense output)
    for j in range(HIDDEN_SIZE):
        rows.append(jnp.full((1, LANES), params["fc_w"][0, j], jnp.float32))
    rows.append(jnp.full((1, LANES), params["fc_b"][0], jnp.float32))

    packed = jnp.concatenate(rows, axis=0)
    _, _, total = _param_layout()
    pad = total - packed.shape[0]
    if pad:
        packed = jnp.pad(packed, ((0, pad), (0, 0)))
    return packed


def pack_x(x):
    """(B, T, in) -> (T*GB, in): row t*GB + k*B + b = x[b, t, :]."""
    xt = jnp.transpose(x, (1, 0, 2))             # (T, B, in)
    xt = jnp.tile(xt, (1, NG, 1))                # (T, GB, in)
    return xt.reshape(SEQ_LENGTH * GB, x.shape[2])


@jax.jit
def lstm_forward(x, packed_params):
    """x: (BATCH, SEQ_LENGTH, INPUT_SIZE). Returns (NUM_LAYERS*BATCH, NUM_CLASSES)."""
    x_packed = pack_x(x)
    vmem = pl.BlockSpec(memory_space=pltpu.MemorySpace.VMEM)
    out_padded = pl.pallas_call(
        lstm_kernel,
        out_shape=jax.ShapeDtypeStruct((OUT_ROWS, LANES), jnp.float32),
        in_specs=[vmem, vmem],
        out_specs=vmem,
        cost_estimate=pl.CostEstimate(flops=4096, transcendentals=512,
                                      bytes_accessed=70_000),
    )(x_packed, packed_params)
    return out_padded[:NUM_LAYERS * BATCH, :NUM_CLASSES]


# --------------------------------------------------------------------------
# parameter init + pure-JAX reference (for correctness checking only)
# --------------------------------------------------------------------------
def make_params(key):
    """Deterministic init mimicking PyTorch's U(-1/sqrt(H), 1/sqrt(H))."""
    k = 1.0 / jnp.sqrt(jnp.float32(HIDDEN_SIZE))
    params = {"lstm": []}
    for l in range(NUM_LAYERS):
        in_dim = INPUT_SIZE if l == 0 else HIDDEN_SIZE
        key, k1, k2, k3, k4 = jax.random.split(key, 5)
        w_ih = jax.random.uniform(k1, (4 * HIDDEN_SIZE, in_dim), jnp.float32, -k, k)
        w_hh = jax.random.uniform(k2, (4 * HIDDEN_SIZE, HIDDEN_SIZE), jnp.float32, -k, k)
        b_ih = jax.random.uniform(k3, (4 * HIDDEN_SIZE,), jnp.float32, -k, k)
        b_hh = jax.random.uniform(k4, (4 * HIDDEN_SIZE,), jnp.float32, -k, k)
        params["lstm"].append((w_ih, w_hh, b_ih, b_hh))
    key, k5, k6 = jax.random.split(key, 3)
    params["fc_w"] = jax.random.uniform(k5, (NUM_CLASSES, HIDDEN_SIZE), jnp.float32, -k, k)
    params["fc_b"] = jax.random.uniform(k6, (NUM_CLASSES,), jnp.float32, -k, k)
    return params


def _ref_cell(x_t, h, c, w_ih, w_hh, b, H):
    gates = x_t @ w_ih.T + h @ w_hh.T + b
    i = jax.nn.sigmoid(gates[:, 0 * H:1 * H])
    f = jax.nn.sigmoid(gates[:, 1 * H:2 * H])
    g = jnp.tanh(gates[:, 2 * H:3 * H])
    o = jax.nn.sigmoid(gates[:, 3 * H:4 * H])
    c_new = f * c + i * g
    return o * jnp.tanh(c_new), c_new


def reference_forward(x, params):
    B = x.shape[0]
    H = HIDDEN_SIZE
    seq = [x[:, t, :] for t in range(SEQ_LENGTH)]
    h_finals = []
    for l in range(NUM_LAYERS):
        w_ih, w_hh, b_ih, b_hh = params["lstm"][l]
        b = (b_ih + b_hh)[None, :]
        h = jnp.zeros((B, H), jnp.float32)
        c = jnp.zeros((B, H), jnp.float32)
        new_seq = []
        for t in range(SEQ_LENGTH):
            h, c = _ref_cell(seq[t], h, c, w_ih, w_hh, b, H)
            new_seq.append(h)
        seq = new_seq
        h_finals.append(h)
    h_out = jnp.concatenate(h_finals, axis=0)
    return h_out @ params["fc_w"].T + params["fc_b"][None, :]


if __name__ == "__main__":
    key = jax.random.PRNGKey(0)
    key, kx = jax.random.split(key)
    x = jax.random.normal(kx, (BATCH, SEQ_LENGTH, INPUT_SIZE), jnp.float32)
    params = make_params(key)
    packed = pack_params(params)

    out = jax.block_until_ready(lstm_forward(x, packed))
    ref = reference_forward(x, params)
    assert out.shape == (NUM_LAYERS * BATCH, NUM_CLASSES)
    assert jnp.allclose(out, ref, atol=1e-4, rtol=1e-4)
    print("KERNEL_OK")
</pallas_src>

<mosaic_0001>
module attributes {stable_mosaic.version = 11 : i64} {
  func.func @lstm_kernel(%arg0: memref<32x1xf32, #tpu.memory_space<vmem>>, %arg1: memref<120x128xf32, #tpu.memory_space<vmem>>, %arg2: memref<8x128xf32, #tpu.memory_space<vmem>>) attributes {dimension_semantics = [], scalar_prefetch = 0 : i64, scratch_operands = 0 : i64, tpu.core_type = #tpu.core_type<tc>} {
    %c0 = arith.constant 0 : index
    %c0_0 = arith.constant 0 : index
    %0 = vector.load %arg0[%c0, %c0_0] : memref<32x1xf32, #tpu.memory_space<vmem>>, vector<8x1xf32>
    %c8 = arith.constant 8 : index
    %c0_1 = arith.constant 0 : index
    %1 = vector.load %arg0[%c8, %c0_1] : memref<32x1xf32, #tpu.memory_space<vmem>>, vector<8x1xf32>
    %c16 = arith.constant 16 : index
    %c0_2 = arith.constant 0 : index
    %2 = vector.load %arg0[%c16, %c0_2] : memref<32x1xf32, #tpu.memory_space<vmem>>, vector<8x1xf32>
    %c24 = arith.constant 24 : index
    %c0_3 = arith.constant 0 : index
    %3 = vector.load %arg0[%c24, %c0_3] : memref<32x1xf32, #tpu.memory_space<vmem>>, vector<8x1xf32>
    %c0_4 = arith.constant 0 : index
    %c0_5 = arith.constant 0 : index
    %4 = vector.load %arg1[%c0_4, %c0_5] : memref<120x128xf32, #tpu.memory_space<vmem>>, vector<8x2xf32>
    %c8_6 = arith.constant 8 : index
    %c0_7 = arith.constant 0 : index
    %5 = vector.load %arg1[%c8_6, %c0_7] : memref<120x128xf32, #tpu.memory_space<vmem>>, vector<8x2xf32>
    %c16_8 = arith.constant 16 : index
    %c0_9 = arith.constant 0 : index
    %6 = vector.load %arg1[%c16_8, %c0_9] : memref<120x128xf32, #tpu.memory_space<vmem>>, vector<8x2xf32>
    %c24_10 = arith.constant 24 : index
    %c0_11 = arith.constant 0 : index
    %7 = vector.load %arg1[%c24_10, %c0_11] : memref<120x128xf32, #tpu.memory_space<vmem>>, vector<8x2xf32>
    %cst = arith.constant 0.000000e+00 : f32
    %8 = vector.broadcast %cst : f32 to vector<2x2xf32>
    %9 = vector.broadcast %0 : vector<8x1xf32> to vector<8x2xf32>
    %10 = arith.mulf %9, %4 : vector<8x2xf32>
    %11 = arith.addf %7, %10 : vector<8x2xf32>
    %12 = arith.negf %11 : vector<8x2xf32>
    %13 = math.exp %12 : vector<8x2xf32>
    %cst_12 = arith.constant 1.000000e+00 : f32
    %14 = vector.broadcast %cst_12 : f32 to vector<8x2xf32>
    %15 = arith.addf %14, %13 : vector<8x2xf32>
    %16 = arith.divf %14, %15 : vector<8x2xf32>
    %17 = math.tanh %11 : vector<8x2xf32>
    %18 = vector.extract_strided_slice %16 {offsets = [0, 0], sizes = [2, 2], strides = [1, 1]} : vector<8x2xf32> to vector<2x2xf32>
    %19 = vector.extract_strided_slice %16 {offsets = [2, 0], sizes = [2, 2], strides = [1, 1]} : vector<8x2xf32> to vector<2x2xf32>
    %20 = vector.extract_strided_slice %17 {offsets = [4, 0], sizes = [2, 2], strides = [1, 1]} : vector<8x2xf32> to vector<2x2xf32>
    %21 = vector.extract_strided_slice %16 {offsets = [6, 0], sizes = [2, 2], strides = [1, 1]} : vector<8x2xf32> to vector<2x2xf32>
    %22 = arith.mulf %19, %8 : vector<2x2xf32>
    %23 = arith.mulf %18, %20 : vector<2x2xf32>
    %24 = arith.addf %22, %23 : vector<2x2xf32>
    %25 = math.tanh %24 : vector<2x2xf32>
    %26 = arith.mulf %21, %25 : vector<2x2xf32>
    %27 = tpu.concatenate %26, %26, %26, %26 in 0 : vector<2x2xf32>, vector<2x2xf32>, vector<2x2xf32>, vector<2x2xf32> -> vector<8x2xf32>
    %28 = vector.broadcast %1 : vector<8x1xf32> to vector<8x2xf32>
    %29 = arith.mulf %28, %4 : vector<8x2xf32>
    %30 = arith.addf %7, %29 : vector<8x2xf32>
    %31 = vector.extract_strided_slice %27 {offsets = [0, 0], sizes = [8, 1], strides = [1, 1]} : vector<8x2xf32> to vector<8x1xf32>
    %32 = vector.broadcast %31 : vector<8x1xf32> to vector<8x2xf32>
    %33 = arith.mulf %32, %5 : vector<8x2xf32>
    %34 = arith.addf %30, %33 : vector<8x2xf32>
    %35 = vector.extract_strided_slice %27 {offsets = [0, 1], sizes = [8, 1], strides = [1, 1]} : vector<8x2xf32> to vector<8x1xf32>
    %36 = vector.broadcast %35 : vector<8x1xf32> to vector<8x2xf32>
    %37 = arith.mulf %36, %6 : vector<8x2xf32>
    %38 = arith.addf %34, %37 : vector<8x2xf32>
    %39 = arith.negf %38 : vector<8x2xf32>
    %40 = math.exp %39 : vector<8x2xf32>
    %cst_13 = arith.constant 1.000000e+00 : f32
    %41 = vector.broadcast %cst_13 : f32 to vector<8x2xf32>
    %42 = arith.addf %41, %40 : vector<8x2xf32>
    %43 = arith.divf %41, %42 : vector<8x2xf32>
    %44 = math.tanh %38 : vector<8x2xf32>
    %45 = vector.extract_strided_slice %43 {offsets = [0, 0], sizes = [2, 2], strides = [1, 1]} : vector<8x2xf32> to vector<2x2xf32>
    %46 = vector.extract_strided_slice %43 {offsets = [2, 0], sizes = [2, 2], strides = [1, 1]} : vector<8x2xf32> to vector<2x2xf32>
    %47 = vector.extract_strided_slice %44 {offsets = [4, 0], sizes = [2, 2], strides = [1, 1]} : vector<8x2xf32> to vector<2x2xf32>
    %48 = vector.extract_strided_slice %43 {offsets = [6, 0], sizes = [2, 2], strides = [1, 1]} : vector<8x2xf32> to vector<2x2xf32>
    %49 = arith.mulf %46, %24 : vector<2x2xf32>
    %50 = arith.mulf %45, %47 : vector<2x2xf32>
    %51 = arith.addf %49, %50 : vector<2x2xf32>
    %52 = math.tanh %51 : vector<2x2xf32>
    %53 = arith.mulf %48, %52 : vector<2x2xf32>
    %54 = tpu.concatenate %53, %53, %53, %53 in 0 : vector<2x2xf32>, vector<2x2xf32>, vector<2x2xf32>, vector<2x2xf32> -> vector<8x2xf32>
    %55 = vector.broadcast %2 : vector<8x1xf32> to vector<8x2xf32>
    %56 = arith.mulf %55, %4 : vector<8x2xf32>
    %57 = arith.addf %7, %56 : vector<8x2xf32>
    %58 = vector.extract_strided_slice %54 {offsets = [0, 0], sizes = [8, 1], strides = [1, 1]} : vector<8x2xf32> to vector<8x1xf32>
    %59 = vector.broadcast %58 : vector<8x1xf32> to vector<8x2xf32>
    %60 = arith.mulf %59, %5 : vector<8x2xf32>
    %61 = arith.addf %57, %60 : vector<8x2xf32>
    %62 = vector.extract_strided_slice %54 {offsets = [0, 1], sizes = [8, 1], strides = [1, 1]} : vector<8x2xf32> to vector<8x1xf32>
    %63 = vector.broadcast %62 : vector<8x1xf32> to vector<8x2xf32>
    %64 = arith.mulf %63, %6 : vector<8x2xf32>
    %65 = arith.addf %61, %64 : vector<8x2xf32>
    %66 = arith.negf %65 : vector<8x2xf32>
    %67 = math.exp %66 : vector<8x2xf32>
    %cst_14 = arith.constant 1.000000e+00 : f32
    %68 = vector.broadcast %cst_14 : f32 to vector<8x2xf32>
    %69 = arith.addf %68, %67 : vector<8x2xf32>
    %70 = arith.divf %68, %69 : vector<8x2xf32>
    %71 = math.tanh %65 : vector<8x2xf32>
    %72 = vector.extract_strided_slice %70 {offsets = [0, 0], sizes = [2, 2], strides = [1, 1]} : vector<8x2xf32> to vector<2x2xf32>
    %73 = vector.extract_strided_slice %70 {offsets = [2, 0], sizes = [2, 2], strides = [1, 1]} : vector<8x2xf32> to vector<2x2xf32>
    %74 = vector.extract_strided_slice %71 {offsets = [4, 0], sizes = [2, 2], strides = [1, 1]} : vector<8x2xf32> to vector<2x2xf32>
    %75 = vector.extract_strided_slice %70 {offsets = [6, 0], sizes = [2, 2], strides = [1, 1]} : vector<8x2xf32> to vector<2x2xf32>
    %76 = arith.mulf %73, %51 : vector<2x2xf32>
    %77 = arith.mulf %72, %74 : vector<2x2xf32>
    %78 = arith.addf %76, %77 : vector<2x2xf32>
    %79 = math.tanh %78 : vector<2x2xf32>
    %80 = arith.mulf %75, %79 : vector<2x2xf32>
    %81 = tpu.concatenate %80, %80, %80, %80 in 0 : vector<2x2xf32>, vector<2x2xf32>, vector<2x2xf32>, vector<2x2xf32> -> vector<8x2xf32>
    %82 = vector.broadcast %3 : vector<8x1xf32> to vector<8x2xf32>
    %83 = arith.mulf %82, %4 : vector<8x2xf32>
    %84 = arith.addf %7, %83 : vector<8x2xf32>
    %85 = vector.extract_strided_slice %81 {offsets = [0, 0], sizes = [8, 1], strides = [1, 1]} : vector<8x2xf32> to vector<8x1xf32>
    %86 = vector.broadcast %85 : vector<8x1xf32> to vector<8x2xf32>
    %87 = arith.mulf %86, %5 : vector<8x2xf32>
    %88 = arith.addf %84, %87 : vector<8x2xf32>
    %89 = vector.extract_strided_slice %81 {offsets = [0, 1], sizes = [8, 1], strides = [1, 1]} : vector<8x2xf32> to vector<8x1xf32>
    %90 = vector.broadcast %89 : vector<8x1xf32> to vector<8x2xf32>
    %91 = arith.mulf %90, %6 : vector<8x2xf32>
    %92 = arith.addf %88, %91 : vector<8x2xf32>
    %93 = arith.negf %92 : vector<8x2xf32>
    %94 = math.exp %93 : vector<8x2xf32>
    %cst_15 = arith.constant 1.000000e+00 : f32
    %95 = vector.broadcast %cst_15 : f32 to vector<8x2xf32>
    %96 = arith.addf %95, %94 : vector<8x2xf32>
    %97 = arith.divf %95, %96 : vector<8x2xf32>
    %98 = math.tanh %92 : vector<8x2xf32>
    %99 = vector.extract_strided_slice %97 {offsets = [0, 0], sizes = [2, 2], strides = [1, 1]} : vector<8x2xf32> to vector<2x2xf32>
    %100 = vector.extract_strided_slice %97 {offsets = [2, 0], sizes = [2, 2], strides = [1, 1]} : vector<8x2xf32> to vector<2x2xf32>
    %101 = vector.extract_strided_slice %98 {offsets = [4, 0], sizes = [2, 2], strides = [1, 1]} : vector<8x2xf32> to vector<2x2xf32>
    %102 = vector.extract_strided_slice %97 {offsets = [6, 0], sizes = [2, 2], strides = [1, 1]} : vector<8x2xf32> to vector<2x2xf32>
    %103 = arith.mulf %100, %78 : vector<2x2xf32>
    %104 = arith.mulf %99, %101 : vector<2x2xf32>
    %105 = arith.addf %103, %104 : vector<2x2xf32>
    %106 = math.tanh %105 : vector<2x2xf32>
    %107 = arith.mulf %102, %106 : vector<2x2xf32>
    %108 = tpu.concatenate %107, %107, %107, %107 in 0 : vector<2x2xf32>, vector<2x2xf32>, vector<2x2xf32>, vector<2x2xf32> -> vector<8x2xf32>
    %c32 = arith.constant 32 : index
    %c0_16 = arith.constant 0 : index
    %109 = vector.load %arg1[%c32, %c0_16] : memref<120x128xf32, #tpu.memory_space<vmem>>, vector<8x2xf32>
    %c40 = arith.constant 40 : index
    %c0_17 = arith.constant 0 : index
    %110 = vector.load %arg1[%c40, %c0_17] : memref<120x128xf32, #tpu.memory_space<vmem>>, vector<8x2xf32>
    %c48 = arith.constant 48 : index
    %c0_18 = arith.constant 0 : index
    %111 = vector.load %arg1[%c48, %c0_18] : memref<120x128xf32, #tpu.memory_space<vmem>>, vector<8x2xf32>
    %c56 = arith.constant 56 : index
    %c0_19 = arith.constant 0 : index
    %112 = vector.load %arg1[%c56, %c0_19] : memref<120x128xf32, #tpu.memory_space<vmem>>, vector<8x2xf32>
    %c64 = arith.constant 64 : index
    %c0_20 = arith.constant 0 : index
    %113 = vector.load %arg1[%c64, %c0_20] : memref<120x128xf32, #tpu.memory_space<vmem>>, vector<8x2xf32>
    %cst_21 = arith.constant 0.000000e+00 : f32
    %114 = vector.broadcast %cst_21 : f32 to vector<2x2xf32>
    %115 = vector.extract_strided_slice %27 {offsets = [0, 0], sizes = [8, 1], strides = [1, 1]} : vector<8x2xf32> to vector<8x1xf32>
    %116 = vector.broadcast %115 : vector<8x1xf32> to vector<8x2xf32>
    %117 = arith.mulf %116, %109 : vector<8x2xf32>
    %118 = arith.addf %113, %117 : vector<8x2xf32>
    %119 = vector.extract_strided_slice %27 {offsets = [0, 1], sizes = [8, 1], strides = [1, 1]} : vector<8x2xf32> to vector<8x1xf32>
    %120 = vector.broadcast %119 : vector<8x1xf32> to vector<8x2xf32>
    %121 = arith.mulf %120, %110 : vector<8x2xf32>
    %122 = arith.addf %118, %121 : vector<8x2xf32>
    %123 = arith.negf %122 : vector<8x2xf32>
    %124 = math.exp %123 : vector<8x2xf32>
    %cst_22 = arith.constant 1.000000e+00 : f32
    %125 = vector.broadcast %cst_22 : f32 to vector<8x2xf32>
    %126 = arith.addf %125, %124 : vector<8x2xf32>
    %127 = arith.divf %125, %126 : vector<8x2xf32>
    %128 = math.tanh %122 : vector<8x2xf32>
    %129 = vector.extract_strided_slice %127 {offsets = [0, 0], sizes = [2, 2], strides = [1, 1]} : vector<8x2xf32> to vector<2x2xf32>
    %130 = vector.extract_strided_slice %127 {offsets = [2, 0], sizes = [2, 2], strides = [1, 1]} : vector<8x2xf32> to vector<2x2xf32>
    %131 = vector.extract_strided_slice %128 {offsets = [4, 0], sizes = [2, 2], strides = [1, 1]} : vector<8x2xf32> to vector<2x2xf32>
    %132 = vector.extract_strided_slice %127 {offsets = [6, 0], sizes = [2, 2], strides = [1, 1]} : vector<8x2xf32> to vector<2x2xf32>
    %133 = arith.mulf %130, %114 : vector<2x2xf32>
    %134 = arith.mulf %129, %131 : vector<2x2xf32>
    %135 = arith.addf %133, %134 : vector<2x2xf32>
    %136 = math.tanh %135 : vector<2x2xf32>
    %137 = arith.mulf %132, %136 : vector<2x2xf32>
    %138 = tpu.concatenate %137, %137, %137, %137 in 0 : vector<2x2xf32>, vector<2x2xf32>, vector<2x2xf32>, vector<2x2xf32> -> vector<8x2xf32>
    %139 = vector.extract_strided_slice %54 {offsets = [0, 0], sizes = [8, 1], strides = [1, 1]} : vector<8x2xf32> to vector<8x1xf32>
    %140 = vector.broadcast %139 : vector<8x1xf32> to vector<8x2xf32>
    %141 = arith.mulf %140, %109 : vector<8x2xf32>
    %142 = arith.addf %113, %141 : vector<8x2xf32>
    %143 = vector.extract_strided_slice %54 {offsets = [0, 1], sizes = [8, 1], strides = [1, 1]} : vector<8x2xf32> to vector<8x1xf32>
    %144 = vector.broadcast %143 : vector<8x1xf32> to vector<8x2xf32>
    %145 = arith.mulf %144, %110 : vector<8x2xf32>
    %146 = arith.addf %142, %145 : vector<8x2xf32>
    %147 = vector.extract_strided_slice %138 {offsets = [0, 0], sizes = [8, 1], strides = [1, 1]} : vector<8x2xf32> to vector<8x1xf32>
    %148 = vector.broadcast %147 : vector<8x1xf32> to vector<8x2xf32>
    %149 = arith.mulf %148, %111 : vector<8x2xf32>
    %150 = arith.addf %146, %149 : vector<8x2xf32>
    %151 = vector.extract_strided_slice %138 {offsets = [0, 1], sizes = [8, 1], strides = [1, 1]} : vector<8x2xf32> to vector<8x1xf32>
    %152 = vector.broadcast %151 : vector<8x1xf32> to vector<8x2xf32>
    %153 = arith.mulf %152, %112 : vector<8x2xf32>
    %154 = arith.addf %150, %153 : vector<8x2xf32>
    %155 = arith.negf %154 : vector<8x2xf32>
    %156 = math.exp %155 : vector<8x2xf32>
    %cst_23 = arith.constant 1.000000e+00 : f32
    %157 = vector.broadcast %cst_23 : f32 to vector<8x2xf32>
    %158 = arith.addf %157, %156 : vector<8x2xf32>
    %159 = arith.divf %157, %158 : vector<8x2xf32>
    %160 = math.tanh %154 : vector<8x2xf32>
    %161 = vector.extract_strided_slice %159 {offsets = [0, 0], sizes = [2, 2], strides = [1, 1]} : vector<8x2xf32> to vector<2x2xf32>
    %162 = vector.extract_strided_slice %159 {offsets = [2, 0], sizes = [2, 2], strides = [1, 1]} : vector<8x2xf32> to vector<2x2xf32>
    %163 = vector.extract_strided_slice %160 {offsets = [4, 0], sizes = [2, 2], strides = [1, 1]} : vector<8x2xf32> to vector<2x2xf32>
    %164 = vector.extract_strided_slice %159 {offsets = [6, 0], sizes = [2, 2], strides = [1, 1]} : vector<8x2xf32> to vector<2x2xf32>
    %165 = arith.mulf %162, %135 : vector<2x2xf32>
    %166 = arith.mulf %161, %163 : vector<2x2xf32>
    %167 = arith.addf %165, %166 : vector<2x2xf32>
    %168 = math.tanh %167 : vector<2x2xf32>
    %169 = arith.mulf %164, %168 : vector<2x2xf32>
    %170 = tpu.concatenate %169, %169, %169, %169 in 0 : vector<2x2xf32>, vector<2x2xf32>, vector<2x2xf32>, vector<2x2xf32> -> vector<8x2xf32>
    %171 = vector.extract_strided_slice %81 {offsets = [0, 0], sizes = [8, 1], strides = [1, 1]} : vector<8x2xf32> to vector<8x1xf32>
    %172 = vector.broadcast %171 : vector<8x1xf32> to vector<8x2xf32>
    %173 = arith.mulf %172, %109 : vector<8x2xf32>
    %174 = arith.addf %113, %173 : vector<8x2xf32>
    %175 = vector.extract_strided_slice %81 {offsets = [0, 1], sizes = [8, 1], strides = [1, 1]} : vector<8x2xf32> to vector<8x1xf32>
    %176 = vector.broadcast %175 : vector<8x1xf32> to vector<8x2xf32>
    %177 = arith.mulf %176, %110 : vector<8x2xf32>
    %178 = arith.addf %174, %177 : vector<8x2xf32>
    %179 = vector.extract_strided_slice %170 {offsets = [0, 0], sizes = [8, 1], strides = [1, 1]} : vector<8x2xf32> to vector<8x1xf32>
    %180 = vector.broadcast %179 : vector<8x1xf32> to vector<8x2xf32>
    %181 = arith.mulf %180, %111 : vector<8x2xf32>
    %182 = arith.addf %178, %181 : vector<8x2xf32>
    %183 = vector.extract_strided_slice %170 {offsets = [0, 1], sizes = [8, 1], strides = [1, 1]} : vector<8x2xf32> to vector<8x1xf32>
    %184 = vector.broadcast %183 : vector<8x1xf32> to vector<8x2xf32>
    %185 = arith.mulf %184, %112 : vector<8x2xf32>
    %186 = arith.addf %182, %185 : vector<8x2xf32>
    %187 = arith.negf %186 : vector<8x2xf32>
    %188 = math.exp %187 : vector<8x2xf32>
    %cst_24 = arith.constant 1.000000e+00 : f32
    %189 = vector.broadcast %cst_24 : f32 to vector<8x2xf32>
    %190 = arith.addf %189, %188 : vector<8x2xf32>
    %191 = arith.divf %189, %190 : vector<8x2xf32>
    %192 = math.tanh %186 : vector<8x2xf32>
    %193 = vector.extract_strided_slice %191 {offsets = [0, 0], sizes = [2, 2], strides = [1, 1]} : vector<8x2xf32> to vector<2x2xf32>
    %194 = vector.extract_strided_slice %191 {offsets = [2, 0], sizes = [2, 2], strides = [1, 1]} : vector<8x2xf32> to vector<2x2xf32>
    %195 = vector.extract_strided_slice %192 {offsets = [4, 0], sizes = [2, 2], strides = [1, 1]} : vector<8x2xf32> to vector<2x2xf32>
    %196 = vector.extract_strided_slice %191 {offsets = [6, 0], sizes = [2, 2], strides = [1, 1]} : vector<8x2xf32> to vector<2x2xf32>
    %197 = arith.mulf %194, %167 : vector<2x2xf32>
    %198 = arith.mulf %193, %195 : vector<2x2xf32>
    %199 = arith.addf %197, %198 : vector<2x2xf32>
    %200 = math.tanh %199 : vector<2x2xf32>
    %201 = arith.mulf %196, %200 : vector<2x2xf32>
    %202 = tpu.concatenate %201, %201, %201, %201 in 0 : vector<2x2xf32>, vector<2x2xf32>, vector<2x2xf32>, vector<2x2xf32> -> vector<8x2xf32>
    %203 = vector.extract_strided_slice %108 {offsets = [0, 0], sizes = [8, 1], strides = [1, 1]} : vector<8x2xf32> to vector<8x1xf32>
    %204 = vector.broadcast %203 : vector<8x1xf32> to vector<8x2xf32>
    %205 = arith.mulf %204, %109 : vector<8x2xf32>
    %206 = arith.addf %113, %205 : vector<8x2xf32>
    %207 = vector.extract_strided_slice %108 {offsets = [0, 1], sizes = [8, 1], strides = [1, 1]} : vector<8x2xf32> to vector<8x1xf32>
    %208 = vector.broadcast %207 : vector<8x1xf32> to vector<8x2xf32>
    %209 = arith.mulf %208, %110 : vector<8x2xf32>
    %210 = arith.addf %206, %209 : vector<8x2xf32>
    %211 = vector.extract_strided_slice %202 {offsets = [0, 0], sizes = [8, 1], strides = [1, 1]} : vector<8x2xf32> to vector<8x1xf32>
    %212 = vector.broadcast %211 : vector<8x1xf32> to vector<8x2xf32>
    %213 = arith.mulf %212, %111 : vector<8x2xf32>
    %214 = arith.addf %210, %213 : vector<8x2xf32>
    %215 = vector.extract_strided_slice %202 {offsets = [0, 1], sizes = [8, 1], strides = [1, 1]} : vector<8x2xf32> to vector<8x1xf32>
    %216 = vector.broadcast %215 : vector<8x1xf32> to vector<8x2xf32>
    %217 = arith.mulf %216, %112 : vector<8x2xf32>
    %218 = arith.addf %214, %217 : vector<8x2xf32>
    %219 = arith.negf %218 : vector<8x2xf32>
    %220 = math.exp %219 : vector<8x2xf32>
    %cst_25 = arith.constant 1.000000e+00 : f32
    %221 = vector.broadcast %cst_25 : f32 to vector<8x2xf32>
    %222 = arith.addf %221, %220 : vector<8x2xf32>
    %223 = arith.divf %221, %222 : vector<8x2xf32>
    %224 = math.tanh %218 : vector<8x2xf32>
    %225 = vector.extract_strided_slice %223 {offsets = [0, 0], sizes = [2, 2], strides = [1, 1]} : vector<8x2xf32> to vector<2x2xf32>
    %226 = vector.extract_strided_slice %223 {offsets = [2, 0], sizes = [2, 2], strides = [1, 1]} : vector<8x2xf32> to vector<2x2xf32>
    %227 = vector.extract_strided_slice %224 {offsets = [4, 0], sizes = [2, 2], strides = [1, 1]} : vector<8x2xf32> to vector<2x2xf32>
    %228 = vector.extract_strided_slice %223 {offsets = [6, 0], sizes = [2, 2], strides = [1, 1]} : vector<8x2xf32> to vector<2x2xf32>
    %229 = arith.mulf %226, %199 : vector<2x2xf32>
    %230 = arith.mulf %225, %227 : vector<2x2xf32>
    %231 = arith.addf %229, %230 : vector<2x2xf32>
    %232 = math.tanh %231 : vector<2x2xf32>
    %233 = arith.mulf %228, %232 : vector<2x2xf32>
    %234 = tpu.concatenate %233, %233, %233, %233 in 0 : vector<2x2xf32>, vector<2x2xf32>, vector<2x2xf32>, vector<2x2xf32> -> vector<8x2xf32>
    %c72 = arith.constant 72 : index
    %c0_26 = arith.constant 0 : index
    %235 = vector.load %arg1[%c72, %c0_26] : memref<120x128xf32, #tpu.memory_space<vmem>>, vector<8x2xf32>
    %c80 = arith.constant 80 : index
    %c0_27 = arith.constant 0 : index
    %236 = vector.load %arg1[%c80, %c0_27] : memref<120x128xf32, #tpu.memory_space<vmem>>, vector<8x2xf32>
    %c88 = arith.constant 88 : index
    %c0_28 = arith.constant 0 : index
    %237 = vector.load %arg1[%c88, %c0_28] : memref<120x128xf32, #tpu.memory_space<vmem>>, vector<8x2xf32>
    %c96 = arith.constant 96 : index
    %c0_29 = arith.constant 0 : index
    %238 = vector.load %arg1[%c96, %c0_29] : memref<120x128xf32, #tpu.memory_space<vmem>>, vector<8x2xf32>
    %c104 = arith.constant 104 : index
    %c0_30 = arith.constant 0 : index
    %239 = vector.load %arg1[%c104, %c0_30] : memref<120x128xf32, #tpu.memory_space<vmem>>, vector<8x2xf32>
    %cst_31 = arith.constant 0.000000e+00 : f32
    %240 = vector.broadcast %cst_31 : f32 to vector<2x2xf32>
    %241 = vector.extract_strided_slice %138 {offsets = [0, 0], sizes = [8, 1], strides = [1, 1]} : vector<8x2xf32> to vector<8x1xf32>
    %242 = vector.broadcast %241 : vector<8x1xf32> to vector<8x2xf32>
    %243 = arith.mulf %242, %235 : vector<8x2xf32>
    %244 = arith.addf %239, %243 : vector<8x2xf32>
    %245 = vector.extract_strided_slice %138 {offsets = [0, 1], sizes = [8, 1], strides = [1, 1]} : vector<8x2xf32> to vector<8x1xf32>
    %246 = vector.broadcast %245 : vector<8x1xf32> to vector<8x2xf32>
    %247 = arith.mulf %246, %236 : vector<8x2xf32>
    %248 = arith.addf %244, %247 : vector<8x2xf32>
    %249 = arith.negf %248 : vector<8x2xf32>
    %250 = math.exp %249 : vector<8x2xf32>
    %cst_32 = arith.constant 1.000000e+00 : f32
    %251 = vector.broadcast %cst_32 : f32 to vector<8x2xf32>
    %252 = arith.addf %251, %250 : vector<8x2xf32>
    %253 = arith.divf %251, %252 : vector<8x2xf32>
    %254 = math.tanh %248 : vector<8x2xf32>
    %255 = vector.extract_strided_slice %253 {offsets = [0, 0], sizes = [2, 2], strides = [1, 1]} : vector<8x2xf32> to vector<2x2xf32>
    %256 = vector.extract_strided_slice %253 {offsets = [2, 0], sizes = [2, 2], strides = [1, 1]} : vector<8x2xf32> to vector<2x2xf32>
    %257 = vector.extract_strided_slice %254 {offsets = [4, 0], sizes = [2, 2], strides = [1, 1]} : vector<8x2xf32> to vector<2x2xf32>
    %258 = vector.extract_strided_slice %253 {offsets = [6, 0], sizes = [2, 2], strides = [1, 1]} : vector<8x2xf32> to vector<2x2xf32>
    %259 = arith.mulf %256, %240 : vector<2x2xf32>
    %260 = arith.mulf %255, %257 : vector<2x2xf32>
    %261 = arith.addf %259, %260 : vector<2x2xf32>
    %262 = math.tanh %261 : vector<2x2xf32>
    %263 = arith.mulf %258, %262 : vector<2x2xf32>
    %264 = tpu.concatenate %263, %263, %263, %263 in 0 : vector<2x2xf32>, vector<2x2xf32>, vector<2x2xf32>, vector<2x2xf32> -> vector<8x2xf32>
    %265 = vector.extract_strided_slice %170 {offsets = [0, 0], sizes = [8, 1], strides = [1, 1]} : vector<8x2xf32> to vector<8x1xf32>
    %266 = vector.broadcast %265 : vector<8x1xf32> to vector<8x2xf32>
    %267 = arith.mulf %266, %235 : vector<8x2xf32>
    %268 = arith.addf %239, %267 : vector<8x2xf32>
    %269 = vector.extract_strided_slice %170 {offsets = [0, 1], sizes = [8, 1], strides = [1, 1]} : vector<8x2xf32> to vector<8x1xf32>
    %270 = vector.broadcast %269 : vector<8x1xf32> to vector<8x2xf32>
    %271 = arith.mulf %270, %236 : vector<8x2xf32>
    %272 = arith.addf %268, %271 : vector<8x2xf32>
    %273 = vector.extract_strided_slice %264 {offsets = [0, 0], sizes = [8, 1], strides = [1, 1]} : vector<8x2xf32> to vector<8x1xf32>
    %274 = vector.broadcast %273 : vector<8x1xf32> to vector<8x2xf32>
    %275 = arith.mulf %274, %237 : vector<8x2xf32>
    %276 = arith.addf %272, %275 : vector<8x2xf32>
    %277 = vector.extract_strided_slice %264 {offsets = [0, 1], sizes = [8, 1], strides = [1, 1]} : vector<8x2xf32> to vector<8x1xf32>
    %278 = vector.broadcast %277 : vector<8x1xf32> to vector<8x2xf32>
    %279 = arith.mulf %278, %238 : vector<8x2xf32>
    %280 = arith.addf %276, %279 : vector<8x2xf32>
    %281 = arith.negf %280 : vector<8x2xf32>
    %282 = math.exp %281 : vector<8x2xf32>
    %cst_33 = arith.constant 1.000000e+00 : f32
    %283 = vector.broadcast %cst_33 : f32 to vector<8x2xf32>
    %284 = arith.addf %283, %282 : vector<8x2xf32>
    %285 = arith.divf %283, %284 : vector<8x2xf32>
    %286 = math.tanh %280 : vector<8x2xf32>
    %287 = vector.extract_strided_slice %285 {offsets = [0, 0], sizes = [2, 2], strides = [1, 1]} : vector<8x2xf32> to vector<2x2xf32>
    %288 = vector.extract_strided_slice %285 {offsets = [2, 0], sizes = [2, 2], strides = [1, 1]} : vector<8x2xf32> to vector<2x2xf32>
    %289 = vector.extract_strided_slice %286 {offsets = [4, 0], sizes = [2, 2], strides = [1, 1]} : vector<8x2xf32> to vector<2x2xf32>
    %290 = vector.extract_strided_slice %285 {offsets = [6, 0], sizes = [2, 2], strides = [1, 1]} : vector<8x2xf32> to vector<2x2xf32>
    %291 = arith.mulf %288, %261 : vector<2x2xf32>
    %292 = arith.mulf %287, %289 : vector<2x2xf32>
    %293 = arith.addf %291, %292 : vector<2x2xf32>
    %294 = math.tanh %293 : vector<2x2xf32>
    %295 = arith.mulf %290, %294 : vector<2x2xf32>
    %296 = tpu.concatenate %295, %295, %295, %295 in 0 : vector<2x2xf32>, vector<2x2xf32>, vector<2x2xf32>, vector<2x2xf32> -> vector<8x2xf32>
    %297 = vector.extract_strided_slice %202 {offsets = [0, 0], sizes = [8, 1], strides = [1, 1]} : vector<8x2xf32> to vector<8x1xf32>
    %298 = vector.broadcast %297 : vector<8x1xf32> to vector<8x2xf32>
    %299 = arith.mulf %298, %235 : vector<8x2xf32>
    %300 = arith.addf %239, %299 : vector<8x2xf32>
    %301 = vector.extract_strided_slice %202 {offsets = [0, 1], sizes = [8, 1], strides = [1, 1]} : vector<8x2xf32> to vector<8x1xf32>
    %302 = vector.broadcast %301 : vector<8x1xf32> to vector<8x2xf32>
    %303 = arith.mulf %302, %236 : vector<8x2xf32>
    %304 = arith.addf %300, %303 : vector<8x2xf32>
    %305 = vector.extract_strided_slice %296 {offsets = [0, 0], sizes = [8, 1], strides = [1, 1]} : vector<8x2xf32> to vector<8x1xf32>
    %306 = vector.broadcast %305 : vector<8x1xf32> to vector<8x2xf32>
    %307 = arith.mulf %306, %237 : vector<8x2xf32>
    %308 = arith.addf %304, %307 : vector<8x2xf32>
    %309 = vector.extract_strided_slice %296 {offsets = [0, 1], sizes = [8, 1], strides = [1, 1]} : vector<8x2xf32> to vector<8x1xf32>
    %310 = vector.broadcast %309 : vector<8x1xf32> to vector<8x2xf32>
    %311 = arith.mulf %310, %238 : vector<8x2xf32>
    %312 = arith.addf %308, %311 : vector<8x2xf32>
    %313 = arith.negf %312 : vector<8x2xf32>
    %314 = math.exp %313 : vector<8x2xf32>
    %cst_34 = arith.constant 1.000000e+00 : f32
    %315 = vector.broadcast %cst_34 : f32 to vector<8x2xf32>
    %316 = arith.addf %315, %314 : vector<8x2xf32>
    %317 = arith.divf %315, %316 : vector<8x2xf32>
    %318 = math.tanh %312 : vector<8x2xf32>
    %319 = vector.extract_strided_slice %317 {offsets = [0, 0], sizes = [2, 2], strides = [1, 1]} : vector<8x2xf32> to vector<2x2xf32>
    %320 = vector.extract_strided_slice %317 {offsets = [2, 0], sizes = [2, 2], strides = [1, 1]} : vector<8x2xf32> to vector<2x2xf32>
    %321 = vector.extract_strided_slice %318 {offsets = [4, 0], sizes = [2, 2], strides = [1, 1]} : vector<8x2xf32> to vector<2x2xf32>
    %322 = vector.extract_strided_slice %317 {offsets = [6, 0], sizes = [2, 2], strides = [1, 1]} : vector<8x2xf32> to vector<2x2xf32>
    %323 = arith.mulf %320, %293 : vector<2x2xf32>
    %324 = arith.mulf %319, %321 : vector<2x2xf32>
    %325 = arith.addf %323, %324 : vector<2x2xf32>
    %326 = math.tanh %325 : vector<2x2xf32>
    %327 = arith.mulf %322, %326 : vector<2x2xf32>
    %328 = tpu.concatenate %327, %327, %327, %327 in 0 : vector<2x2xf32>, vector<2x2xf32>, vector<2x2xf32>, vector<2x2xf32> -> vector<8x2xf32>
    %329 = vector.extract_strided_slice %234 {offsets = [0, 0], sizes = [8, 1], strides = [1, 1]} : vector<8x2xf32> to vector<8x1xf32>
    %330 = vector.broadcast %329 : vector<8x1xf32> to vector<8x2xf32>
    %331 = arith.mulf %330, %235 : vector<8x2xf32>
    %332 = arith.addf %239, %331 : vector<8x2xf32>
    %333 = vector.extract_strided_slice %234 {offsets = [0, 1], sizes = [8, 1], strides = [1, 1]} : vector<8x2xf32> to vector<8x1xf32>
    %334 = vector.broadcast %333 : vector<8x1xf32> to vector<8x2xf32>
    %335 = arith.mulf %334, %236 : vector<8x2xf32>
    %336 = arith.addf %332, %335 : vector<8x2xf32>
    %337 = vector.extract_strided_slice %328 {offsets = [0, 0], sizes = [8, 1], strides = [1, 1]} : vector<8x2xf32> to vector<8x1xf32>
    %338 = vector.broadcast %337 : vector<8x1xf32> to vector<8x2xf32>
    %339 = arith.mulf %338, %237 : vector<8x2xf32>
    %340 = arith.addf %336, %339 : vector<8x2xf32>
    %341 = vector.extract_strided_slice %328 {offsets = [0, 1], sizes = [8, 1], strides = [1, 1]} : vector<8x2xf32> to vector<8x1xf32>
    %342 = vector.broadcast %341 : vector<8x1xf32> to vector<8x2xf32>
    %343 = arith.mulf %342, %238 : vector<8x2xf32>
    %344 = arith.addf %340, %343 : vector<8x2xf32>
    %345 = arith.negf %344 : vector<8x2xf32>
    %346 = math.exp %345 : vector<8x2xf32>
    %cst_35 = arith.constant 1.000000e+00 : f32
    %347 = vector.broadcast %cst_35 : f32 to vector<8x2xf32>
    %348 = arith.addf %347, %346 : vector<8x2xf32>
    %349 = arith.divf %347, %348 : vector<8x2xf32>
    %350 = math.tanh %344 : vector<8x2xf32>
    %351 = vector.extract_strided_slice %349 {offsets = [0, 0], sizes = [2, 2], strides = [1, 1]} : vector<8x2xf32> to vector<2x2xf32>
    %352 = vector.extract_strided_slice %349 {offsets = [2, 0], sizes = [2, 2], strides = [1, 1]} : vector<8x2xf32> to vector<2x2xf32>
    %353 = vector.extract_strided_slice %350 {offsets = [4, 0], sizes = [2, 2], strides = [1, 1]} : vector<8x2xf32> to vector<2x2xf32>
    %354 = vector.extract_strided_slice %349 {offsets = [6, 0], sizes = [2, 2], strides = [1, 1]} : vector<8x2xf32> to vector<2x2xf32>
    %355 = arith.mulf %352, %325 : vector<2x2xf32>
    %356 = arith.mulf %351, %353 : vector<2x2xf32>
    %357 = arith.addf %355, %356 : vector<2x2xf32>
    %358 = math.tanh %357 : vector<2x2xf32>
    %359 = arith.mulf %354, %358 : vector<2x2xf32>
    %cst_36 = arith.constant 0.000000e+00 : f32
    %360 = vector.broadcast %cst_36 : f32 to vector<2x2xf32>
    %361 = tpu.concatenate %107, %233, %359, %360 in 0 : vector<2x2xf32>, vector<2x2xf32>, vector<2x2xf32>, vector<2x2xf32> -> vector<8x2xf32>
    %c114 = arith.constant 114 : index
    %c0_37 = arith.constant 0 : index
    %362 = vector.load %arg1[%c114, %c0_37] : memref<120x128xf32, #tpu.memory_space<vmem>>, vector<1x128xf32>
    %363 = vector.shape_cast %362 : vector<1x128xf32> to vector<1x128xf32>
    %364 = vector.broadcast %363 : vector<1x128xf32> to vector<8x128xf32>
    %365 = vector.extract_strided_slice %361 {offsets = [0, 0], sizes = [8, 1], strides = [1, 1]} : vector<8x2xf32> to vector<8x1xf32>
    %c112 = arith.constant 112 : index
    %c0_38 = arith.constant 0 : index
    %366 = vector.load %arg1[%c112, %c0_38] : memref<120x128xf32, #tpu.memory_space<vmem>>, vector<1x128xf32>
    %367 = vector.broadcast %365 : vector<8x1xf32> to vector<8x128xf32>
    %368 = vector.broadcast %366 : vector<1x128xf32> to vector<8x128xf32>
    %369 = arith.mulf %367, %368 : vector<8x128xf32>
    %370 = arith.addf %364, %369 : vector<8x128xf32>
    %371 = vector.extract_strided_slice %361 {offsets = [0, 1], sizes = [8, 1], strides = [1, 1]} : vector<8x2xf32> to vector<8x1xf32>
    %c113 = arith.constant 113 : index
    %c0_39 = arith.constant 0 : index
    %372 = vector.load %arg1[%c113, %c0_39] : memref<120x128xf32, #tpu.memory_space<vmem>>, vector<1x128xf32>
    %373 = vector.broadcast %371 : vector<8x1xf32> to vector<8x128xf32>
    %374 = vector.broadcast %372 : vector<1x128xf32> to vector<8x128xf32>
    %375 = arith.mulf %373, %374 : vector<8x128xf32>
    %376 = arith.addf %370, %375 : vector<8x128xf32>
    %c0_40 = arith.constant 0 : index
    %c0_41 = arith.constant 0 : index
    %377 = vector.load %arg2[%c0_40, %c0_41] : memref<8x128xf32, #tpu.memory_space<vmem>>, vector<8x128xf32>
    tpu.vector_store %arg2[%c0_40, %c0_41], %376 {strides = array<i32>} : memref<8x128xf32, #tpu.memory_space<vmem>>, vector<8x128xf32>,
    return
  }
}

</mosaic_0001>

<bundles_post_ra>
// kernel: lstm_forward.1
= control target key start
LH: loop header
LB: loop body
LE: loop exit
PB: predicated region body
PF: predicated region fallthrough
CT: control target
= control target key end

     0   :  { %7 = vsyncpa [#allocation3], 0  ;;  %s791_s9 = smov [#allocation2]   ;;  %s991_s0 = inlined_call_operand.vmem [shape: f32[32,1], index: 0, kind: input, shape index: {}]   ;;  %s992_s1 = inlined_call_operand.hbm [shape: f32[120,128], index: 1, kind: input, shape index: {}]   ;;  %s993_s2 = inlined_call_operand.vmem [shape: f32[8,128], index: 2, kind: output, shape index: {}]  }
   0x1   :  { %s15_s10 = sshll.u32 %s791_s9, 4  ;;  %s16_s10 = int_to_ptr.vmem [resolvable:$true] %s15_s10 }
   0x2   :  { %s777_s11 = scalar_lea.vmem %s16_s10, 1920  ;;  %p782_p1 = scmp.lt.s32.totalorder %s16_s10, %s16_s10 }
   0x3   :  { %p778_p0 = scmp.ne.s32.totalorder %s16_s10, %s777_s11  ;;  %p783_p2 = scmp.lt.s32.totalorder %s777_s11, %s777_s11 }
   0x5   :  { %p784_p3 = por %p783_p2, %p782_p1 }
   0x7   :  { %p785_p4 = pnand %p784_p3, %p778_p0 }
   0x9   :  { %788 = shalt.err (!%p785_p4)
}
   0xa   :  { %s792_s12 = smov 128   ;;  %s793_s13 = smov 8  }
   0xb   :  { %21 = dma.hbm_to_vmem [thread:$0]  %s992_s1, 1920, %s16_s10, [#allocation3], %s792_s12, %s792_s12, %s793_s13  }
   0xc   :  { %789 = dma.done.wait [#allocation3], 1920  }
   0xd   :  { %790 = vsyncadd [#allocation3], 4294965376  ;;  %v794_v0 = vmov 0   ;;  %v25_v1 = vld [vmem:[%s991_s0] sm:$0xff]  ;;  %v26_v2 = vld [vmem:[%s991_s0 + $0x8] sm:$0xff]  ;;  %v795_v4 = vmov 1  }
   0xe   :  { %663 = vset.pattern.permute.xlu0 %v794_v0  ;;  %664 = vset.pattern.permute.xlu1 %v794_v0  ;;  %v27_v3 = vld [vmem:[%s991_s0 + $0x10] sm:$0xff]  ;;  %v826_v5 = vld [vmem:[#allocation2] sm:$0xff]  ;;  %v828_v6 = vld [vmem:[#allocation2 + $0x18] sm:$0xff]  ;;  %vm68_vm0 = vcmask 1041408   ;;  %vm70_vm1 = vcmask 1043456   ;;  %vm72_vm2 = vcmask 1045504  }
   0xf   :  { %35 = vperm.xlu0 %663, %v25_v1   ;;  %v837_v30 = vld [vmem:[#allocation2 + $0x8] sm:$0xff]  ;;  %v839_v31 = vld [vmem:[#allocation2 + $0x20] sm:$0xff]  ;;  %v846_v37 = vld [vmem:[#allocation2 + $0x10] sm:$0xff] }
  0x10   :  { %v844_v36 = vld [vmem:[#allocation2 + $0x40] sm:$0xff]  ;;  %v848_v38 = vld [vmem:[#allocation2 + $0x28] sm:$0xff] }
  0x13   :  { %76 = vperm.xlu0 %663, %v26_v2  }
  0x17   :  { %127 = vperm.xlu0 %663, %v27_v3  }
  0x1b   :  { %667 = vset.pattern.permute.xlu0 %v795_v4 }
  0x8a   :  { %v36_v7 = vpop.permute.xlu0 %35 }
  0x8b   :  { %v38_v8 = vmul.f32 %v36_v7, %v826_v5 }
  0x8d   :  { %v39_v9 = vadd.f32 %v38_v8, %v828_v6 }
  0x8e   :  { %v77_v29 = vpop.permute.xlu0 %76 }
  0x8f   :  { %v643_v10 = vmul.f32 -1.442695, %v39_v9  ;;  %v79_v32 = vmul.f32 %v77_v29, %v826_v5 }
  0x91   :  { %673 = vpow2.f32 %v643_v10  ;;  %v80_v39 = vadd.f32 %v79_v32, %v828_v6 }
  0x92   :  { %675 = vtanh.f32 %v39_v9 }
  0x9e   :  { %v674_v11 = vpop.eup %673 }
  0x9f   :  { %v43_v12 = vadd.f32 1.0, %v674_v11  ;;  %v676_v13 = vpop.eup %675 }
  0xa0   :  { %v49_v14 = vrot.slane %v676_v13, 4 }
  0xa1   :  { %677 = vrcp.f32 %v43_v12 }
  0xae   :  { %v678_v15 = vpop.eup %677 }
  0xaf   :  { %v51_v16 = vmul.f32 %v678_v15, %v49_v14  ;;  %v47_v17 = vmul.f32 0.0, %v678_v15 }
  0xb1   :  { %v53_v18 = vrot.slane %v51_v16, 6 }
  0xb3   :  { %v55_v19 = vadd.f32 %v53_v18, %v47_v17 }
  0xb5   :  { %679 = vtanh.f32 %v55_v19 }
  0xc2   :  { %v680_v20 = vpop.eup %679 }
  0xc3   :  { %v58_v21 = vrot.slane %v680_v20, 4 }
  0xc5   :  { %v60_v22 = vmul.f32 %v678_v15, %v58_v21 }
  0xc7   :  { %v62_v23 = vrot.slane %v60_v22, 6  ;;  %v64_v24 = vrot.slane %v60_v22, 4  ;;  %v66_v25 = vrot.slane %v60_v22, 2 }
  0xc9   :  { %v69_v26 = vsel %vm68_vm0, %v62_v23, %v64_v24 }
  0xca   :  { %v71_v27 = vsel %vm70_vm1, %v69_v26, %v66_v25  ;;  %v28_v25 = vld [vmem:[%s991_s0 + $0x18] sm:$0xff]  ;;  %v128_v26 = vpop.permute.xlu0 %127 }
  0xcb   :  { %v73_v28 = vsel %vm72_vm2, %v71_v27, %v60_v22  ;;  %v130_v27 = vmul.f32 %v128_v26, %v826_v5 }
  0xcc   :  { %83 = vperm.xlu1 %664, %v73_v28  }
  0xcd   :  { %v131_v32 = vadd.f32 %v130_v27, %v828_v6 }
  0xd0   :  { %665 = vset.pattern.permute.xlu1 %v795_v4 }
  0xd1   :  { %89 = vperm.xlu1 %665, %v73_v28  }
  0xd5   :  { %666 = vset.pattern.permute.xlu1 %v794_v0 }
 0x147   :  { %v84_v33 = vpop.permute.xlu1 %83 }
 0x148   :  { %v86_v34 = vmul.f32 %v84_v33, %v837_v30  ;;  %v232_v35 = vmul.f32 %v839_v31, %v84_v33 }
 0x14a   :  { %v87_v41 = vadd.f32 %v86_v34, %v80_v39  ;;  %v233_v42 = vadd.f32 %v232_v35, %v844_v36 }
 0x14c   :  { %v90_v40 = vpop.permute.xlu1 %89 }
 0x14d   :  { %v92_v43 = vmul.f32 %v90_v40, %v846_v37  ;;  %v234_v44 = vmul.f32 %v848_v38, %v90_v40  ;;  %v878_v40 = vld [vmem:[#allocation2 + $0x30] sm:$0xff] }
 0x14f   :  { %v93_v45 = vadd.f32 %v92_v43, %v87_v41  ;;  %v235_v46 = vadd.f32 %v234_v44, %v233_v42  ;;  %v880_v41 = vld [vmem:[#allocation2 + $0x48] sm:$0xff] }
 0x151   :  { %v644_v47 = vmul.f32 -1.442695, %v93_v45  ;;  %v647_v48 = vmul.f32 -1.442695, %v235_v46 }
 0x153   :  { %681 = vpow2.f32 %v644_v47 }
 0x154   :  { %683 = vpow2.f32 %v647_v48 }
 0x155   :  { %685 = vtanh.f32 %v93_v45 }
 0x156   :  { %687 = vtanh.f32 %v235_v46 }
 0x160   :  { %v682_v49 = vpop.eup %681 }
 0x161   :  { %v684_v50 = vpop.eup %683  ;;  %v97_v51 = vadd.f32 1.0, %v682_v49  ;;  %v885_v49 = vld [vmem:[#allocation2 + $0x68] sm:$0xff] }
 0x162   :  { %v239_v52 = vadd.f32 1.0, %v684_v50  ;;  %v686_v53 = vpop.eup %685  ;;  %v887_v50 = vld [vmem:[#allocation2 + $0x38] sm:$0xff] }
 0x163   :  { %689 = vrcp.f32 %v97_v51  ;;  %v688_v54 = vpop.eup %687  ;;  %v103_v55 = vrot.slane %v686_v53, 4  ;;  %v889_v51 = vld [vmem:[#allocation2 + $0x50] sm:$0xff] }
 0x164   :  { %691 = vrcp.f32 %v239_v52  ;;  %v245_v57 = vrot.slane %v688_v54, 4 }
 0x170   :  { %v690_v56 = vpop.eup %689 }
 0x171   :  { %v692_v58 = vpop.eup %691  ;;  %v105_v59 = vmul.f32 %v690_v56, %v103_v55  ;;  %v101_v61 = vmul.f32 %v690_v56, %v55_v19 }
 0x172   :  { %v247_v60 = vmul.f32 %v692_v58, %v245_v57  ;;  %v243_v63 = vmul.f32 0.0, %v692_v58 }
 0x173   :  { %v107_v62 = vrot.slane %v105_v59, 6 }
 0x174   :  { %v249_v1 = vrot.slane %v247_v60, 6 }
 0x175   :  { %v854_v2 = vadd.f32 %v107_v62, %v101_v61 }
 0x176   :  { %v856_v3 = vadd.f32 %v249_v1, %v243_v63 }
 0x177   :  { %693 = vtanh.f32 %v854_v2 }
 0x178   :  { %695 = vtanh.f32 %v856_v3 }
 0x184   :  { %v694_v7 = vpop.eup %693 }
 0x185   :  { %v696_v8 = vpop.eup %695  ;;  %v112_v9 = vrot.slane %v694_v7, 4 }
 0x186   :  { %v254_v10 = vrot.slane %v696_v8, 4 }
 0x187   :  { %v114_v11 = vmul.f32 %v690_v56, %v112_v9 }
 0x188   :  { %v256_v12 = vmul.f32 %v692_v58, %v254_v10 }
 0x189   :  { %v116_v13 = vrot.slane %v114_v11, 6  ;;  %v118_v14 = vrot.slane %v114_v11, 4  ;;  %v120_v15 = vrot.slane %v114_v11, 2 }
 0x18a   :  { %v258_v16 = vrot.slane %v256_v12, 6  ;;  %v260_v17 = vrot.slane %v256_v12, 4  ;;  %v262_v18 = vrot.slane %v256_v12, 2 }
 0x18b   :  { %v122_v19 = vsel %vm68_vm0, %v116_v13, %v118_v14 }
 0x18c   :  { %v123_v20 = vsel %vm70_vm1, %v122_v19, %v120_v15  ;;  %v264_v21 = vsel %vm68_vm0, %v258_v16, %v260_v17 }
 0x18d   :  { %v124_v22 = vsel %vm72_vm2, %v123_v20, %v114_v11  ;;  %v265_v23 = vsel %vm70_vm1, %v264_v21, %v262_v18 }
 0x18e   :  { %140 = vperm.xlu0 %667, %v124_v22   ;;  %134 = vperm.xlu1 %666, %v124_v22   ;;  %v266_v24 = vsel %vm72_vm2, %v265_v23, %v256_v12 }
 0x192   :  { %273 = vperm.xlu1 %666, %v266_v24   ;;  %669 = vset.pattern.permute.xlu0 %v794_v0 }
 0x193   :  { %178 = vperm.xlu0 %669, %v28_v25  }
 0x196   :  { %668 = vset.pattern.permute.xlu1 %v795_v4 }
 0x197   :  { %279 = vperm.xlu1 %668, %v266_v24  }
 0x19b   :  { %670 = vset.pattern.permute.xlu1 %v794_v0 }
 0x209   :  { %v135_v28 = vpop.permute.xlu1 %134  ;;  %v141_v29 = vpop.permute.xlu0 %140 }
 0x20a   :  { %v137_v33 = vmul.f32 %v135_v28, %v837_v30  ;;  %v267_v34 = vmul.f32 %v839_v31, %v135_v28  ;;  %v143_v0 = vmul.f32 %v141_v29, %v846_v37  ;;  %v269_v42 = vmul.f32 %v848_v38, %v141_v29 }
 0x20c   :  { %v138_v35 = vadd.f32 %v137_v33, %v131_v32  ;;  %v268_v39 = vadd.f32 %v267_v34, %v844_v36 }
 0x20d   :  { %v274_v43 = vpop.permute.xlu1 %273 }
 0x20e   :  { %v144_v44 = vadd.f32 %v143_v0, %v138_v35  ;;  %v270_v45 = vadd.f32 %v269_v42, %v268_v39  ;;  %v276_v46 = vmul.f32 %v274_v43, %v878_v40  ;;  %v425_v47 = vmul.f32 %v880_v41, %v274_v43 }
 0x210   :  { %v645_v48 = vmul.f32 -1.442695, %v144_v44  ;;  %v277_v53 = vadd.f32 %v276_v46, %v270_v45  ;;  %v426_v54 = vadd.f32 %v425_v47, %v885_v49 }
 0x212   :  { %697 = vpow2.f32 %v645_v48  ;;  %v280_v52 = vpop.permute.xlu1 %279 }
 0x213   :  { %v282_v55 = vmul.f32 %v280_v52, %v887_v50  ;;  %v427_v56 = vmul.f32 %v889_v51, %v280_v52 }
 0x215   :  { %v283_v57 = vadd.f32 %v282_v55, %v277_v53  ;;  %v428_v58 = vadd.f32 %v427_v56, %v426_v54 }
 0x217   :  { %v648_v59 = vmul.f32 -1.442695, %v283_v57  ;;  %v651_v60 = vmul.f32 -1.442695, %v428_v58 }
 0x219   :  { %699 = vpow2.f32 %v648_v59 }
 0x21a   :  { %701 = vpow2.f32 %v651_v60 }
 0x21b   :  { %703 = vtanh.f32 %v144_v44 }
 0x21f   :  { %v698_v61 = vpop.eup %697 }
 0x220   :  { %v148_v62 = vadd.f32 1.0, %v698_v61 }
 0x222   :  { %705 = vrcp.f32 %v148_v62 }
 0x223   :  { %707 = vtanh.f32 %v283_v57 }
 0x224   :  { %709 = vtanh.f32 %v428_v58 }
 0x226   :  { %v700_v63 = vpop.eup %699 }
 0x227   :  { %v702_v1 = vpop.eup %701  ;;  %v287_v7 = vadd.f32 1.0, %v700_v63 }
 0x228   :  { %v432_v8 = vadd.f32 1.0, %v702_v1  ;;  %v704_v9 = vpop.eup %703  ;;  %v179_v1 = vpop.permute.xlu0 %178 }
 0x229   :  { %711 = vrcp.f32 %v287_v7  ;;  %v154_v10 = vrot.slane %v704_v9, 4  ;;  %v181_v7 = vmul.f32 %v179_v1, %v826_v5 }
 0x22a   :  { %713 = vrcp.f32 %v432_v8 }
 0x22b   :  { %v182_v9 = vadd.f32 %v181_v7, %v828_v6 }
 0x22f   :  { %v706_v11 = vpop.eup %705 }
 0x230   :  { %v156_v12 = vmul.f32 %v706_v11, %v154_v10  ;;  %v708_v13 = vpop.eup %707  ;;  %v152_v14 = vmul.f32 %v706_v11, %v854_v2 }
 0x231   :  { %v710_v16 = vpop.eup %709  ;;  %v293_v18 = vrot.slane %v708_v13, 4 }
 0x232   :  { %v158_v15 = vrot.slane %v156_v12, 6  ;;  %v438_v20 = vrot.slane %v710_v16, 4 }
 0x234   :  { %v895_v17 = vadd.f32 %v158_v15, %v152_v14 }
 0x236   :  { %v712_v19 = vpop.eup %711  ;;  %715 = vtanh.f32 %v895_v17 }
 0x237   :  { %v714_v21 = vpop.eup %713  ;;  %v295_v22 = vmul.f32 %v712_v19, %v293_v18  ;;  %v291_v24 = vmul.f32 %v712_v19, %v856_v3 }
 0x238   :  { %v440_v23 = vmul.f32 %v714_v21, %v438_v20  ;;  %v436_v26 = vmul.f32 0.0, %v714_v21 }
 0x239   :  { %v297_v25 = vrot.slane %v295_v22, 6  ;;  %v924_v22 = vld [vmem:[#allocation2 + $0x58] sm:$0xff] }
 0x23a   :  { %v442_v27 = vrot.slane %v440_v23, 6 }
 0x23b   :  { %v899_v28 = vadd.f32 %v297_v25, %v291_v24 }
 0x23c   :  { %v901_v2 = vadd.f32 %v442_v27, %v436_v26  ;;  %v929_v27 = vld [vmem:[#allocation2 + $0x60] sm:$0xff] }
 0x23d   :  { %717 = vtanh.f32 %v899_v28 }
 0x23e   :  { %719 = vtanh.f32 %v901_v2 }
 0x243   :  { %v716_v29 = vpop.eup %715 }
 0x244   :  { %v163_v32 = vrot.slane %v716_v29, 4 }
 0x246   :  { %v165_v33 = vmul.f32 %v706_v11, %v163_v32 }
 0x248   :  { %v167_v34 = vrot.slane %v165_v33, 6  ;;  %v169_v35 = vrot.slane %v165_v33, 4  ;;  %v171_v39 = vrot.slane %v165_v33, 2 }
 0x24a   :  { %v718_v0 = vpop.eup %717  ;;  %v173_v3 = vsel %vm68_vm0, %v167_v34, %v169_v35 }
 0x24b   :  { %v720_v42 = vpop.eup %719  ;;  %v174_v43 = vsel %vm70_vm1, %v173_v3, %v171_v39  ;;  %v302_v44 = vrot.slane %v718_v0, 4 }
 0x24c   :  { %v175_v45 = vsel %vm72_vm2, %v174_v43, %v165_v33  ;;  %v447_v46 = vrot.slane %v720_v42, 4 }
 0x24d   :  { %185 = vperm.xlu1 %670, %v175_v45   ;;  %v304_v47 = vmul.f32 %v712_v19, %v302_v44 }
 0x24e   :  { %v449_v48 = vmul.f32 %v714_v21, %v447_v46 }
 0x24f   :  { %v306_v52 = vrot.slane %v304_v47, 6  ;;  %v308_v53 = vrot.slane %v304_v47, 4  ;;  %v310_v54 = vrot.slane %v304_v47, 2 }
 0x250   :  { %v451_v55 = vrot.slane %v449_v48, 6  ;;  %v453_v56 = vrot.slane %v449_v48, 4  ;;  %v455_v57 = vrot.slane %v449_v48, 2 }
 0x251   :  { %671 = vset.pattern.permute.xlu1 %v795_v4  ;;  %v312_v58 = vsel %vm68_vm0, %v306_v52, %v308_v53 }
 0x252   :  { %191 = vperm.xlu1 %671, %v175_v45   ;;  %v313_v59 = vsel %vm70_vm1, %v312_v58, %v310_v54  ;;  %v457_v60 = vsel %vm68_vm0, %v451_v55, %v453_v56 }
 0x253   :  { %v314_v61 = vsel %vm72_vm2, %v313_v59, %v304_v47  ;;  %v458_v62 = vsel %vm70_vm1, %v457_v60, %v455_v57 }
 0x254   :  { %321 = vperm.xlu0 %669, %v314_v61   ;;  %v459_v63 = vsel %vm72_vm2, %v458_v62, %v449_v48 }
 0x256   :  { %327 = vperm.xlu1 %671, %v314_v61  }
 0x258   :  { %466 = vperm.xlu0 %669, %v459_v63  }
 0x25a   :  { %472 = vperm.xlu1 %671, %v459_v63  }
 0x2c8   :  { %v186_v8 = vpop.permute.xlu1 %185 }
 0x2c9   :  { %v188_v10 = vmul.f32 %v186_v8, %v837_v30  ;;  %v315_v11 = vmul.f32 %v839_v31, %v186_v8 }
 0x2cb   :  { %v189_v13 = vadd.f32 %v188_v10, %v182_v9  ;;  %v316_v14 = vadd.f32 %v315_v11, %v844_v36 }
 0x2cd   :  { %v192_v12 = vpop.permute.xlu1 %191 }
 0x2ce   :  { %v194_v15 = vmul.f32 %v192_v12, %v846_v37  ;;  %v317_v16 = vmul.f32 %v848_v38, %v192_v12 }
 0x2cf   :  { %v322_v18 = vpop.permute.xlu0 %321 }
 0x2d0   :  { %v195_v19 = vadd.f32 %v194_v15, %v189_v13  ;;  %v318_v20 = vadd.f32 %v317_v16, %v316_v14  ;;  %v324_v5 = vmul.f32 %v322_v18, %v878_v40  ;;  %v460_v21 = vmul.f32 %v880_v41, %v322_v18 }
 0x2d1   :  { %v328_v6 = vpop.permute.xlu1 %327 }
 0x2d2   :  { %v646_v30 = vmul.f32 -1.442695, %v195_v19  ;;  %v325_v23 = vadd.f32 %v324_v5, %v318_v20  ;;  %v461_v24 = vadd.f32 %v460_v21, %v885_v49  ;;  %v330_v25 = vmul.f32 %v328_v6, %v887_v50 }
 0x2d3   :  { %v462_v37 = vmul.f32 %v889_v51, %v328_v6  ;;  %v467_v26 = vpop.permute.xlu0 %466 }
 0x2d4   :  { %721 = vpow2.f32 %v646_v30  ;;  %v469_v29 = vmul.f32 %v467_v26, %v924_v22  ;;  %v331_v32 = vadd.f32 %v330_v25, %v325_v23 }
 0x2d5   :  { %v463_v33 = vadd.f32 %v462_v37, %v461_v24  ;;  %v473_v34 = vpop.permute.xlu1 %472 }
 0x2d6   :  { %v475_v35 = vmul.f32 %v473_v34, %v929_v27  ;;  %v649_v39 = vmul.f32 -1.442695, %v331_v32 }
 0x2d7   :  { %v470_v0 = vadd.f32 %v469_v29, %v463_v33 }
 0x2d8   :  { %723 = vpow2.f32 %v649_v39 }
 0x2d9   :  { %v476_v3 = vadd.f32 %v475_v35, %v470_v0 }
 0x2db   :  { %v652_v42 = vmul.f32 -1.442695, %v476_v3 }
 0x2dd   :  { %725 = vpow2.f32 %v652_v42 }
 0x2de   :  { %727 = vtanh.f32 %v195_v19 }
 0x2e1   :  { %v722_v43 = vpop.eup %721 }
 0x2e2   :  { %v199_v44 = vadd.f32 1.0, %v722_v43 }
 0x2e4   :  { %729 = vrcp.f32 %v199_v44 }
 0x2e5   :  { %731 = vtanh.f32 %v331_v32  ;;  %v724_v45 = vpop.eup %723 }
 0x2e6   :  { %v335_v46 = vadd.f32 1.0, %v724_v45  ;;  %733 = vtanh.f32 %v476_v3 }
 0x2e8   :  { %735 = vrcp.f32 %v335_v46 }
 0x2ea   :  { %v726_v47 = vpop.eup %725 }
 0x2eb   :  { %v480_v48 = vadd.f32 1.0, %v726_v47  ;;  %v728_v52 = vpop.eup %727 }
 0x2ec   :  { %v205_v53 = vrot.slane %v728_v52, 4 }
 0x2ed   :  { %737 = vrcp.f32 %v480_v48 }
 0x2f1   :  { %v730_v54 = vpop.eup %729 }
 0x2f2   :  { %v732_v55 = vpop.eup %731  ;;  %v207_v56 = vmul.f32 %v730_v54, %v205_v53  ;;  %v203_v57 = vmul.f32 %v730_v54, %v895_v17 }
 0x2f3   :  { %v734_v59 = vpop.eup %733  ;;  %v341_v60 = vrot.slane %v732_v55, 4 }
 0x2f4   :  { %v209_v58 = vrot.slane %v207_v56, 6  ;;  %v486_v8 = vrot.slane %v734_v59, 4 }
 0x2f5   :  { %v736_v61 = vpop.eup %735 }
 0x2f6   :  { %v211_v62 = vadd.f32 %v209_v58, %v203_v57  ;;  %v343_v63 = vmul.f32 %v736_v61, %v341_v60  ;;  %v339_v1 = vmul.f32 %v736_v61, %v899_v28 }
 0x2f8   :  { %739 = vtanh.f32 %v211_v62  ;;  %v345_v7 = vrot.slane %v343_v63, 6 }
 0x2fa   :  { %v738_v9 = vpop.eup %737  ;;  %v935_v10 = vadd.f32 %v345_v7, %v339_v1 }
 0x2fb   :  { %v488_v11 = vmul.f32 %v738_v9, %v486_v8  ;;  %v484_v12 = vmul.f32 %v738_v9, %v901_v2 }
 0x2fc   :  { %741 = vtanh.f32 %v935_v10 }
 0x2fd   :  { %v490_v13 = vrot.slane %v488_v11, 6 }
 0x2ff   :  { %v939_v17 = vadd.f32 %v490_v13, %v484_v12 }
 0x301   :  { %743 = vtanh.f32 %v939_v17 }
 0x305   :  { %v740_v14 = vpop.eup %739 }
 0x306   :  { %v214_v15 = vrot.slane %v740_v14, 4 }
 0x308   :  { %v942_v16 = vmul.f32 %v730_v54, %v214_v15 }
 0x309   :  { %v742_v28 = vpop.eup %741 }
 0x30a   :  { %v218_v18 = vrot.slane %v942_v16, 6  ;;  %v220_v19 = vrot.slane %v942_v16, 4  ;;  %v222_v20 = vrot.slane %v942_v16, 2  ;;  %v350_v5 = vrot.slane %v742_v28, 4 }
 0x30c   :  { %v224_v2 = vsel %vm68_vm0, %v218_v18, %v220_v19  ;;  %v352_v6 = vmul.f32 %v736_v61, %v350_v5 }
 0x30d   :  { %v225_v21 = vsel %vm70_vm1, %v224_v2, %v222_v20 }
 0x30e   :  { %v744_v30 = vpop.eup %743  ;;  %v226_v23 = vsel %vm72_vm2, %v225_v21, %v942_v16  ;;  %v354_v24 = vrot.slane %v352_v6, 6  ;;  %v356_v25 = vrot.slane %v352_v6, 4  ;;  %v358_v37 = vrot.slane %v352_v6, 2 }
 0x30f   :  { %371 = vperm.xlu1 %671, %v226_v23   ;;  %365 = vperm.xlu0 %669, %v226_v23   ;;  %v495_v26 = vrot.slane %v744_v30, 4 }
 0x310   :  { %v360_v29 = vsel %vm68_vm0, %v354_v24, %v356_v25 }
 0x311   :  { %v497_v32 = vmul.f32 %v738_v9, %v495_v26  ;;  %v361_v33 = vsel %vm70_vm1, %v360_v29, %v358_v37 }
 0x312   :  { %v362_v34 = vsel %vm72_vm2, %v361_v33, %v352_v6 }
 0x313   :  { %v499_v35 = vrot.slane %v497_v32, 6  ;;  %v501_v39 = vrot.slane %v497_v32, 4  ;;  %v503_v0 = vrot.slane %v497_v32, 2  ;;  %384 = vperm.xlu1 %671, %v362_v34   ;;  %378 = vperm.xlu0 %669, %v362_v34  }
 0x315   :  { %v505_v3 = vsel %vm68_vm0, %v499_v35, %v501_v39 }
 0x316   :  { %v506_v42 = vsel %vm70_vm1, %v505_v3, %v503_v0 }
 0x317   :  { %v507_v43 = vsel %vm72_vm2, %v506_v42, %v497_v32 }
 0x318   :  { %520 = vperm.xlu1 %671, %v507_v43   ;;  %514 = vperm.xlu0 %669, %v507_v43  }
 0x38a   :  { %v372_v44 = vpop.permute.xlu1 %371  ;;  %v366_v45 = vpop.permute.xlu0 %365 }
 0x38b   :  { %v368_v46 = vmul.f32 %v366_v45, %v839_v31  ;;  %v374_v47 = vmul.f32 %v372_v44, %v848_v38 }
 0x38d   :  { %v369_v48 = vadd.f32 %v368_v46, %v844_v36 }
 0x38e   :  { %v385_v53 = vpop.permute.xlu1 %384  ;;  %v379_v54 = vpop.permute.xlu0 %378 }
 0x38f   :  { %v375_v52 = vadd.f32 %v374_v47, %v369_v48  ;;  %v381_v55 = vmul.f32 %v379_v54, %v878_v40  ;;  %v508_v56 = vmul.f32 %v880_v41, %v379_v54  ;;  %v387_v57 = vmul.f32 %v385_v53, %v887_v50 }
 0x390   :  { %v510_v58 = vmul.f32 %v889_v51, %v385_v53 }
 0x391   :  { %v382_v59 = vadd.f32 %v381_v55, %v375_v52  ;;  %v509_v60 = vadd.f32 %v508_v56, %v885_v49 }
 0x393   :  { %v521_v61 = vpop.permute.xlu1 %520  ;;  %v515_v31 = vpop.permute.xlu0 %514  ;;  %v388_v62 = vadd.f32 %v387_v57, %v382_v59  ;;  %v511_v38 = vadd.f32 %v510_v58, %v509_v60 }
 0x394   :  { %v517_v36 = vmul.f32 %v515_v31, %v924_v22  ;;  %v523_v1 = vmul.f32 %v521_v61, %v929_v27 }
 0x395   :  { %v650_v63 = vmul.f32 -1.442695, %v388_v62 }
 0x396   :  { %v518_v7 = vadd.f32 %v517_v36, %v511_v38 }
 0x397   :  { %745 = vpow2.f32 %v650_v63 }
 0x398   :  { %v524_v40 = vadd.f32 %v523_v1, %v518_v7 }
 0x39a   :  { %v653_v8 = vmul.f32 -1.442695, %v524_v40 }
 0x39c   :  { %747 = vpow2.f32 %v653_v8 }
 0x39d   :  { %749 = vtanh.f32 %v388_v62 }
 0x39e   :  { %751 = vtanh.f32 %v524_v40 }
 0x3a4   :  { %v746_v50 = vpop.eup %745 }
 0x3a5   :  { %v392_v9 = vadd.f32 1.0, %v746_v50 }
 0x3a7   :  { %753 = vrcp.f32 %v392_v9 }
 0x3a9   :  { %v748_v11 = vpop.eup %747 }
 0x3aa   :  { %v528_v12 = vadd.f32 1.0, %v748_v11  ;;  %v750_v13 = vpop.eup %749 }
 0x3ab   :  { %v752_v14 = vpop.eup %751  ;;  %v398_v15 = vrot.slane %v750_v13, 4  ;;  %v656_v13 = vld [vmem:[#allocation2 + $0x70] ss:$0 sm:$0xff] }
 0x3ac   :  { %755 = vrcp.f32 %v528_v12  ;;  %v534_v5 = vrot.slane %v752_v14, 4  ;;  %v657_v14 = vld [vmem:[#allocation2 + $0x71] ss:$0 sm:$0xff] }
 0x3b4   :  { %v754_v28 = vpop.eup %753 }
 0x3b5   :  { %v400_v19 = vmul.f32 %v754_v28, %v398_v15  ;;  %v396_v2 = vmul.f32 %v754_v28, %v935_v10 }
 0x3b7   :  { %v402_v20 = vrot.slane %v400_v19, 6 }
 0x3b9   :  { %v756_v21 = vpop.eup %755  ;;  %v404_v30 = vadd.f32 %v402_v20, %v396_v2 }
 0x3ba   :  { %v536_v6 = vmul.f32 %v756_v21, %v534_v5  ;;  %v532_v23 = vmul.f32 %v756_v21, %v939_v17 }
 0x3bb   :  { %757 = vtanh.f32 %v404_v30 }
 0x3bc   :  { %v538_v24 = vrot.slane %v536_v6, 6 }
 0x3be   :  { %v540_v25 = vadd.f32 %v538_v24, %v532_v23 }
 0x3c0   :  { %759 = vtanh.f32 %v540_v25 }
 0x3c8   :  { %v758_v37 = vpop.eup %757 }
 0x3c9   :  { %v407_v26 = vrot.slane %v758_v37, 4 }
 0x3cb   :  { %v409_v29 = vmul.f32 %v754_v28, %v407_v26  ;;  %v655_v28 = vld [vmem:[#allocation2 + $0x72] ss:$0 sm:$0xff] }
 0x3cd   :  { %v760_v32 = vpop.eup %759  ;;  %v411_v33 = vrot.slane %v409_v29, 6  ;;  %v413_v34 = vrot.slane %v409_v29, 4  ;;  %v415_v35 = vrot.slane %v409_v29, 2 }
 0x3ce   :  { %v543_v39 = vrot.slane %v760_v32, 4 }
 0x3cf   :  { %v417_v0 = vsel %vm68_vm0, %v411_v33, %v413_v34  ;;  %v606_v9 = vsel %vm68_vm0, %v218_v18, %v413_v34 }
 0x3d0   :  { %v545_v10 = vmul.f32 %v756_v21, %v543_v39  ;;  %v418_v3 = vsel %vm70_vm1, %v417_v0, %v415_v35 }
 0x3d1   :  { %v419_v42 = vsel %vm72_vm2, %v418_v3, %v409_v29 }
 0x3d2   :  { %v547_v17 = vrot.slane %v545_v10, 6  ;;  %v549_v43 = vrot.slane %v545_v10, 4  ;;  %v551_v44 = vrot.slane %v545_v10, 2  ;;  %564 = vperm.xlu1 %671, %v419_v42   ;;  %558 = vperm.xlu0 %669, %v419_v42  }
 0x3d4   :  { %v553_v45 = vsel %vm68_vm0, %v547_v17, %v549_v43 }
 0x3d5   :  { %v554_v46 = vsel %vm70_vm1, %v553_v45, %v551_v44 }
 0x3d6   :  { %v555_v47 = vsel %vm72_vm2, %v554_v46, %v545_v10 }
 0x3d7   :  { %577 = vperm.xlu1 %671, %v555_v47   ;;  %571 = vperm.xlu0 %669, %v555_v47  }
 0x44d   :  { %v565_v48 = vpop.permute.xlu1 %564  ;;  %v559_v52 = vpop.permute.xlu0 %558 }
 0x44e   :  { %v561_v53 = vmul.f32 %v559_v52, %v880_v41  ;;  %v567_v54 = vmul.f32 %v565_v48, %v889_v51 }
 0x450   :  { %v562_v55 = vadd.f32 %v561_v53, %v885_v49 }
 0x452   :  { %v578_v56 = vpop.permute.xlu1 %577  ;;  %v572_v57 = vpop.permute.xlu0 %571  ;;  %v568_v58 = vadd.f32 %v567_v54, %v562_v55 }
 0x453   :  { %v574_v59 = vmul.f32 %v572_v57, %v924_v22  ;;  %v580_v60 = vmul.f32 %v578_v56, %v929_v27 }
 0x455   :  { %v575_v61 = vadd.f32 %v574_v59, %v568_v58 }
 0x457   :  { %v581_v31 = vadd.f32 %v580_v60, %v575_v61 }
 0x459   :  { %v654_v62 = vmul.f32 -1.442695, %v581_v31 }
 0x45b   :  { %761 = vpow2.f32 %v654_v62 }
 0x45c   :  { %763 = vtanh.f32 %v581_v31 }
 0x468   :  { %v762_v38 = vpop.eup %761 }
 0x469   :  { %v585_v36 = vadd.f32 1.0, %v762_v38  ;;  %v764_v41 = vpop.eup %763 }
 0x46a   :  { %v591_v63 = vrot.slane %v764_v41, 4 }
 0x46b   :  { %765 = vrcp.f32 %v585_v36 }
 0x478   :  { %v766_v51 = vpop.eup %765 }
 0x479   :  { %v593_v1 = vmul.f32 %v766_v51, %v591_v63  ;;  %v589_v7 = vmul.f32 %v766_v51, %v540_v25 }
 0x47b   :  { %v595_v49 = vrot.slane %v593_v1, 6 }
 0x47d   :  { %v597_v40 = vadd.f32 %v595_v49, %v589_v7 }
 0x47f   :  { %767 = vtanh.f32 %v597_v40 }
 0x48c   :  { %v768_v8 = vpop.eup %767 }
 0x48d   :  { %v600_v22 = vrot.slane %v768_v8, 4 }
 0x48f   :  { %v602_v50 = vmul.f32 %v766_v51, %v600_v22 }
 0x491   :  { %v604_v27 = vrot.slane %v602_v50, 2 }
 0x493   :  { %v607_v11 = vsel %vm70_vm1, %v606_v9, %v604_v27 }
 0x494   :  { %v608_v12 = vsel %vm72_vm2, %v607_v11, 0.0 }
 0x495   :  { %628 = vperm.xlu1 %671, %v608_v12   ;;  %617 = vperm.xlu0 %669, %v608_v12  }
 0x499   :  { %672 = vset.pattern.permute.xlu0 %v795_v4 }
 0x510   :  { %v629_v15 = vpop.permute.xlu1 %628  ;;  %v618_v19 = vpop.permute.xlu0 %617 }
 0x511   :  { %v624_v20 = vmul.f32 %v656_v13, %v618_v19  ;;  %v635_v5 = vmul.f32 %v657_v14, %v629_v15 }
 0x513   :  { %v625_v2 = vadd.f32 %v655_v28, %v624_v20 }
 0x515   :  { %v636_v21 = vadd.f32 %v635_v5, %v625_v2 }
 0x517   :  { %637 = vst [vmem:[%s993_s2] sm:$0xff] %v636_v21 }
 0x518   :  { %642 = vsyncpa [#allocation3], 1 }

</bundles_post_ra>
